<compile_context>
chip_gen: v7x
topology: tpu7x:2x2x1
jax: 0.10.0
libtpu: 0.0.40
codegen_flags: <defaults>
</compile_context>

<pallas_src>
import jax
import jax.numpy as jnp
from jax.experimental import pallas as pl
from jax.experimental.pallas import tpu as pltpu

LATENT_DIM = 32
MASK_WIDTH = 25          # the `y = maskinput` concat width
HIDDEN = 128             # hidden_dims[0]
OUT_WIDTH = 128          # midi_width (include_durations=False)

ROW_TILE = 2048          # max rows per grid step (multiple of 8)
SINGLE_BLOCK_MAX = 1024  # up to this many rows: one full-array block, no alignment needed


def _round_up(x, m):
    return ((x + m - 1) // m) * m


def _choose_row_tile(n):
    """Rows per grid step. Small n -> one full block; large n -> >=2 blocks of <=ROW_TILE."""
    if n <= SINGLE_BLOCK_MAX:
        return n                                   # full-dim block: exempt from 8/128 rule
    # At least two blocks (v7x megacore), each a multiple of 8 rows, capped at ROW_TILE.
    return min(ROW_TILE, _round_up(-(-n // 2), 8))


def decoder_kernel(z_ref, y_ref, w1z_ref, w1m_ref, b1_ref, w2_ref, b2_ref,
                   m_ref, o_ref):
    """Fused hot path: (split) Linear -> tanh -> Linear -> sigmoid -> masked_fill."""
    # First layer: x @ W1 with x = concat([z, maskinput]) expressed as two dots
    # on the split weight blocks (no concatenated activation in HBM).
    # Matmul operands in bf16 (MXU-native on v5e/v6e/v7x), accumulate in f32.
    z_bf = z_ref[...].astype(jnp.bfloat16)
    y_bf = y_ref[...].astype(jnp.bfloat16)
    pre1 = (
        jnp.dot(z_bf, w1z_ref[...], preferred_element_type=jnp.float32)
        + jnp.dot(y_bf, w1m_ref[...], preferred_element_type=jnp.float32)
        + b1_ref[...]
    )                                                          # (TN, HIDDEN) f32
    h = jnp.tanh(pre1)
    logits = (
        jnp.dot(h.astype(jnp.bfloat16), w2_ref[...],
                preferred_element_type=jnp.float32)
        + b2_ref[...]
    )                                                          # (TN, OUT_WIDTH) f32
    y_out = jax.nn.sigmoid(logits)
    # torch.masked_fill(z, masks.bool(), 0.0): f32 mask consumed directly.
    o_ref[...] = jnp.where(m_ref[...] != 0, 0.0, y_out).astype(o_ref.dtype)


def init_params(key, latent_dim=LATENT_DIM):
    """Deterministic parameter init (shapes from Decoder.__init__).

    W1 is stored pre-split along its input dim: w1z for the latent part,
    w1m for the 25-wide maskinput part (y = [z|m] @ W1 == z@w1z + m@w1m).
    Weight matrices are stored in bf16 (MXU operands); biases stay f32.
    """
    k1, k2, k3, k4 = jax.random.split(key, 4)
    in1 = latent_dim + MASK_WIDTH
    w1 = jax.random.normal(k1, (in1, HIDDEN), jnp.float32) * (1.0 / jnp.sqrt(in1))
    b1 = jax.random.normal(k2, (1, HIDDEN), jnp.float32) * 0.01
    w2 = jax.random.normal(k3, (HIDDEN, OUT_WIDTH), jnp.float32) * (1.0 / jnp.sqrt(HIDDEN))
    b2 = jax.random.normal(k4, (1, OUT_WIDTH), jnp.float32) * 0.01
    w1z = w1[:latent_dim].astype(jnp.bfloat16)   # (latent, 128)
    w1m = w1[latent_dim:].astype(jnp.bfloat16)   # (25, 128)
    w2 = w2.astype(jnp.bfloat16)                 # (128, 128)
    return w1z, w1m, b1, w2, b2


def decoder_forward(z, params, maskinput=None, masks=None, out_dtype=jnp.float32):
    """Mirrors Decoder.forward(z, maskinput=..., masks=...)."""
    N, latent_dim = z.shape
    assert N % 25 == 0, "batch rows must reshape to (-1, 25, 128)"
    B = N // 25
    if maskinput is None:
        maskinput = jnp.zeros((N, MASK_WIDTH), z.dtype)
    if masks is None:
        masks = jnp.zeros((B, 25, OUT_WIDTH), z.dtype)

    w1z, w1m, b1, w2, b2 = params

    # View-only reshape of the contiguous mask; no dtype conversion pass.
    m2 = masks.reshape(N, OUT_WIDTH)

    tn = _choose_row_tile(N)
    n_blocks = pl.cdiv(N, tn)

    param_bytes = (w1z.size + w1m.size + w2.size) * w1z.dtype.itemsize \
                  + (b1.size + b2.size) * 4
    cost = pl.CostEstimate(
        flops=2 * N * ((latent_dim + MASK_WIDTH) * HIDDEN + HIDDEN * OUT_WIDTH),
        transcendentals=N * (HIDDEN + OUT_WIDTH),
        bytes_accessed=(4 * N * (latent_dim + MASK_WIDTH)           # z + maskinput
                        + m2.dtype.itemsize * N * OUT_WIDTH          # mask (as-is)
                        + jnp.dtype(out_dtype).itemsize * N * OUT_WIDTH  # output
                        + param_bytes),
    )

    out = pl.pallas_call(
        decoder_kernel,
        out_shape=jax.ShapeDtypeStruct((N, OUT_WIDTH), out_dtype),
        grid=(n_blocks,),
        in_specs=[
            pl.BlockSpec((tn, latent_dim), lambda i: (i, 0)),     # z tile
            pl.BlockSpec((tn, MASK_WIDTH), lambda i: (i, 0)),     # maskinput tile
            pl.BlockSpec(w1z.shape, lambda i: (0, 0)),            # weights stay resident
            pl.BlockSpec(w1m.shape, lambda i: (0, 0)),
            pl.BlockSpec(b1.shape, lambda i: (0, 0)),
            pl.BlockSpec(w2.shape, lambda i: (0, 0)),
            pl.BlockSpec(b2.shape, lambda i: (0, 0)),
            pl.BlockSpec((tn, OUT_WIDTH), lambda i: (i, 0)),      # mask tile (native dtype)
        ],
        out_specs=pl.BlockSpec((tn, OUT_WIDTH), lambda i: (i, 0)),
        compiler_params=pltpu.CompilerParams(
            dimension_semantics=("parallel",)),
        cost_estimate=cost,
    )(z, maskinput, w1z, w1m, b1, w2, b2, m2)

    # The `z.view(-1, 25, 128)` reshape (pure view / glue).
    return out.reshape(-1, 25, OUT_WIDTH)


def decoder_forward_ref(z, params, maskinput=None, masks=None):
    """Pure-JAX f32 reference for correctness checking."""
    N = z.shape[0]
    B = N // 25
    if maskinput is None:
        maskinput = jnp.zeros((N, MASK_WIDTH), z.dtype)
    if masks is None:
        masks = jnp.zeros((B, 25, OUT_WIDTH), z.dtype)
    w1z, w1m, b1, w2, b2 = params
    w1 = jnp.concatenate([w1z, w1m], axis=0).astype(jnp.float32)
    x = jnp.concatenate([z, maskinput], axis=1)
    h = jnp.tanh(x @ w1 + b1)
    y = jax.nn.sigmoid(h @ w2.astype(jnp.float32) + b2)
    y = y.reshape(-1, 25, OUT_WIDTH)
    return jnp.where(masks != 0, 0.0, y)


if __name__ == "__main__":
    key = jax.random.PRNGKey(0)
    kp, kz, km, ky = jax.random.split(key, 4)

    params = init_params(kp)

    B = 2                                  # 2 "songs"
    N = B * 25                             # 50 flattened rows (view(-1, 25, 128))
    z = jax.random.normal(kz, (N, LATENT_DIM), jnp.float32)
    maskinput = jax.random.normal(ky, (N, MASK_WIDTH), jnp.float32)
    # Non-trivial mask to exercise masked_fill.
    masks = (jax.random.uniform(km, (B, 25, OUT_WIDTH)) > 0.7).astype(jnp.float32)

    out = decoder_forward(z, params, maskinput=maskinput, masks=masks)
    out = jax.block_until_ready(out)

    ref = decoder_forward_ref(z, params, maskinput=maskinput, masks=masks)
    assert out.shape == (B, 25, OUT_WIDTH)
    assert jnp.all(jnp.isfinite(out))
    # bf16 matmul operands vs f32 reference math: looser tolerance on [0,1] sigmoid outputs.
    assert float(jnp.max(jnp.abs(out - ref))) < 2e-2
    # Masked positions must be exactly zero (masked_fill semantics).
    assert jnp.all(jnp.where(masks != 0, out, 0.0) == 0.0)

    print("KERNEL_OK")
</pallas_src>

<mosaic_0001>
module attributes {stable_mosaic.version = 11 : i64} {
  func.func @decoder_kernel(%arg0: i32, %arg1: memref<50x32xf32, #tpu.memory_space<vmem>>, %arg2: memref<50x25xf32, #tpu.memory_space<vmem>>, %arg3: memref<32x128xbf16, #tpu.memory_space<vmem>>, %arg4: memref<25x128xbf16, #tpu.memory_space<vmem>>, %arg5: memref<1x128xf32, #tpu.memory_space<vmem>>, %arg6: memref<128x128xbf16, #tpu.memory_space<vmem>>, %arg7: memref<1x128xf32, #tpu.memory_space<vmem>>, %arg8: memref<50x128xf32, #tpu.memory_space<vmem>>, %arg9: memref<50x128xf32, #tpu.memory_space<vmem>>) attributes {dimension_semantics = [#tpu.dimension_semantics<parallel>], iteration_bounds = array<i64: 1>, scalar_prefetch = 0 : i64, scratch_operands = 0 : i64, tpu.core_type = #tpu.core_type<tc>, window_params = [{transform_indices = @transform_0, window_bounds = array<i64: 50, 32>}, {transform_indices = @transform_1, window_bounds = array<i64: 50, 25>}, {pipeline_mode = #tpu.pipeline_mode<synchronous>, transform_indices = @transform_2, window_bounds = array<i64: 32, 128>}, {pipeline_mode = #tpu.pipeline_mode<synchronous>, transform_indices = @transform_3, window_bounds = array<i64: 25, 128>}, {pipeline_mode = #tpu.pipeline_mode<synchronous>, transform_indices = @transform_4, window_bounds = array<i64: 1, 128>}, {pipeline_mode = #tpu.pipeline_mode<synchronous>, transform_indices = @transform_5, window_bounds = array<i64: 128, 128>}, {pipeline_mode = #tpu.pipeline_mode<synchronous>, transform_indices = @transform_6, window_bounds = array<i64: 1, 128>}, {transform_indices = @transform_7, window_bounds = array<i64: 50, 128>}, {transform_indices = @transform_8, window_bounds = array<i64: 50, 128>}]} {
    %c0 = arith.constant 0 : index
    %c0_0 = arith.constant 0 : index
    %0 = vector.load %arg1[%c0, %c0_0] : memref<50x32xf32, #tpu.memory_space<vmem>>, vector<50x32xf32>
    %1 = arith.truncf %0 : vector<50x32xf32> to vector<50x32xbf16>
    %c0_1 = arith.constant 0 : index
    %c0_2 = arith.constant 0 : index
    %2 = vector.load %arg2[%c0_1, %c0_2] : memref<50x25xf32, #tpu.memory_space<vmem>>, vector<50x25xf32>
    %3 = arith.truncf %2 : vector<50x25xf32> to vector<50x25xbf16>
    %c0_3 = arith.constant 0 : index
    %c0_4 = arith.constant 0 : index
    %4 = vector.load %arg3[%c0_3, %c0_4] : memref<32x128xbf16, #tpu.memory_space<vmem>>, vector<32x128xbf16>
    %cst = arith.constant dense<0.000000e+00> : vector<50x128xf32>
    %5 = tpu.matmul %1, %4, %cst {dimension_numbers = #tpu.dot_dimension_numbers<[1], [0], [0], [1], [0, 0, 1, 1], [], []>} : vector<50x32xbf16>, vector<32x128xbf16>, vector<50x128xf32> -> vector<50x128xf32>
    %c0_5 = arith.constant 0 : index
    %c0_6 = arith.constant 0 : index
    %6 = vector.load %arg4[%c0_5, %c0_6] : memref<25x128xbf16, #tpu.memory_space<vmem>>, vector<25x128xbf16>
    %cst_7 = arith.constant dense<0.000000e+00> : vector<50x128xf32>
    %7 = tpu.matmul %3, %6, %cst_7 {dimension_numbers = #tpu.dot_dimension_numbers<[1], [0], [0], [1], [0, 0, 1, 1], [], []>} : vector<50x25xbf16>, vector<25x128xbf16>, vector<50x128xf32> -> vector<50x128xf32>
    %8 = arith.addf %5, %7 : vector<50x128xf32>
    %c0_8 = arith.constant 0 : index
    %c0_9 = arith.constant 0 : index
    %9 = vector.load %arg5[%c0_8, %c0_9] : memref<1x128xf32, #tpu.memory_space<vmem>>, vector<1x128xf32>
    %10 = vector.broadcast %9 : vector<1x128xf32> to vector<50x128xf32>
    %11 = arith.addf %8, %10 : vector<50x128xf32>
    %12 = math.tanh %11 : vector<50x128xf32>
    %13 = arith.truncf %12 : vector<50x128xf32> to vector<50x128xbf16>
    %c0_10 = arith.constant 0 : index
    %c0_11 = arith.constant 0 : index
    %14 = vector.load %arg6[%c0_10, %c0_11] : memref<128x128xbf16, #tpu.memory_space<vmem>>, vector<128x128xbf16>
    %cst_12 = arith.constant dense<0.000000e+00> : vector<50x128xf32>
    %15 = tpu.matmul %13, %14, %cst_12 {dimension_numbers = #tpu.dot_dimension_numbers<[1], [0], [0], [1], [0, 0, 1, 1], [], []>} : vector<50x128xbf16>, vector<128x128xbf16>, vector<50x128xf32> -> vector<50x128xf32>
    %c0_13 = arith.constant 0 : index
    %c0_14 = arith.constant 0 : index
    %16 = vector.load %arg7[%c0_13, %c0_14] : memref<1x128xf32, #tpu.memory_space<vmem>>, vector<1x128xf32>
    %17 = vector.broadcast %16 : vector<1x128xf32> to vector<50x128xf32>
    %18 = arith.addf %15, %17 : vector<50x128xf32>
    %19 = arith.negf %18 : vector<50x128xf32>
    %20 = math.exp %19 : vector<50x128xf32>
    %cst_15 = arith.constant 1.000000e+00 : f32
    %21 = vector.broadcast %cst_15 : f32 to vector<50x128xf32>
    %22 = arith.addf %21, %20 : vector<50x128xf32>
    %23 = arith.divf %21, %22 : vector<50x128xf32>
    %c0_16 = arith.constant 0 : index
    %c0_17 = arith.constant 0 : index
    %24 = vector.load %arg8[%c0_16, %c0_17] : memref<50x128xf32, #tpu.memory_space<vmem>>, vector<50x128xf32>
    %cst_18 = arith.constant 0.000000e+00 : f32
    %25 = vector.broadcast %cst_18 : f32 to vector<50x128xf32>
    %26 = arith.cmpf one, %24, %25 : vector<50x128xf32>
    %cst_19 = arith.constant 0.000000e+00 : f32
    %27 = vector.broadcast %cst_19 : f32 to vector<50x128xf32>
    %28 = arith.select %26, %27, %23 : vector<50x128xi1>, vector<50x128xf32>
    %c0_20 = arith.constant 0 : index
    %c0_21 = arith.constant 0 : index
    %29 = vector.load %arg9[%c0_20, %c0_21] : memref<50x128xf32, #tpu.memory_space<vmem>>, vector<50x128xf32>
    tpu.vector_store %arg9[%c0_20, %c0_21], %28 {strides = array<i32>} : memref<50x128xf32, #tpu.memory_space<vmem>>, vector<50x128xf32>,
    return
  }
  func.func @transform_0(%arg0: i32) -> (i32, i32) {
    %c0_i32 = arith.constant 0 : i32
    %c0_i32_0 = arith.constant 0 : i32
    return %arg0, %c0_i32 : i32, i32
  }
  func.func @transform_1(%arg0: i32) -> (i32, i32) {
    %c0_i32 = arith.constant 0 : i32
    %c0_i32_0 = arith.constant 0 : i32
    return %arg0, %c0_i32 : i32, i32
  }
  func.func @transform_2(%arg0: i32) -> (i32, i32) {
    %c0_i32 = arith.constant 0 : i32
    %c0_i32_0 = arith.constant 0 : i32
    %c0_i32_1 = arith.constant 0 : i32
    return %c0_i32, %c0_i32_0 : i32, i32
  }
  func.func @transform_3(%arg0: i32) -> (i32, i32) {
    %c0_i32 = arith.constant 0 : i32
    %c0_i32_0 = arith.constant 0 : i32
    %c0_i32_1 = arith.constant 0 : i32
    return %c0_i32, %c0_i32_0 : i32, i32
  }
  func.func @transform_4(%arg0: i32) -> (i32, i32) {
    %c0_i32 = arith.constant 0 : i32
    %c0_i32_0 = arith.constant 0 : i32
    %c0_i32_1 = arith.constant 0 : i32
    return %c0_i32, %c0_i32_0 : i32, i32
  }
  func.func @transform_5(%arg0: i32) -> (i32, i32) {
    %c0_i32 = arith.constant 0 : i32
    %c0_i32_0 = arith.constant 0 : i32
    %c0_i32_1 = arith.constant 0 : i32
    return %c0_i32, %c0_i32_0 : i32, i32
  }
  func.func @transform_6(%arg0: i32) -> (i32, i32) {
    %c0_i32 = arith.constant 0 : i32
    %c0_i32_0 = arith.constant 0 : i32
    %c0_i32_1 = arith.constant 0 : i32
    return %c0_i32, %c0_i32_0 : i32, i32
  }
  func.func @transform_7(%arg0: i32) -> (i32, i32) {
    %c0_i32 = arith.constant 0 : i32
    %c0_i32_0 = arith.constant 0 : i32
    return %arg0, %c0_i32 : i32, i32
  }
  func.func @transform_8(%arg0: i32) -> (i32, i32) {
    %c0_i32 = arith.constant 0 : i32
    %c0_i32_0 = arith.constant 0 : i32
    return %arg0, %c0_i32 : i32, i32
  }
}

</mosaic_0001>

<bundles_post_ra>
// kernel: tpu_custom_call.1
= control target key start
LH: loop header
LB: loop body
LE: loop exit
PB: predicated region body
PF: predicated region fallthrough
CT: control target
= control target key end

     0   :  { %13 = vsyncpa [#allocation3], 0  ;;  %s899_s0 = inlined_call_operand.vmem [shape: f32[50,32], index: 0, kind: input, shape index: {}]   ;;  %s900_s1 = inlined_call_operand.vmem [shape: f32[50,25], index: 1, kind: input, shape index: {}]   ;;  %s901_s2 = inlined_call_operand.vmem [shape: bf16[32,128], index: 2, kind: input, shape index: {}]   ;;  %s902_s3 = inlined_call_operand.hbm [shape: bf16[25,128], index: 3, kind: input, shape index: {}]   ;;  %s903_s4 = inlined_call_operand.vmem [shape: f32[1,128], index: 4, kind: input, shape index: {}]   ;;  %s904_s5 = inlined_call_operand.vmem [shape: bf16[128,128], index: 5, kind: input, shape index: {}]   ;;  %s905_s6 = inlined_call_operand.vmem [shape: f32[1,128], index: 6, kind: input, shape index: {}]   ;;  %s906_s7 = inlined_call_operand.vmem [shape: f32[50,128], index: 7, kind: input, shape index: {}]   ;;  %s907_s8 = inlined_call_operand.hbm [shape: f32[50,128], index: 8, kind: output, shape index: {}]  }
   0x1   :  { %14 = vsyncpa [#allocation4], 0  ;;  %s720_s27 = smov [#allocation2]   ;;  %s672_s9 = scalar_lea.hbm %s902_s3, 256 }
   0x2   :  { %s26_s28 = sshll.u32 %s720_s27, 4  ;;  %p673_p0 = scmp.ne.s32.totalorder %s902_s3, %s672_s9  ;;  %s27_s28 = int_to_ptr.vmem [resolvable:$true] %s26_s28 }
   0x3   :  { %p676_p1 = scmp.lt.u32.totalorder %s672_s9, %s902_s3 }
   0x5   :  { %p678_p2 = pnand %p676_p1, %p673_p0 }
   0x7   :  { %681 = shalt.err (!%p678_p2)
}
   0x8   :  { %s682_s14 = scalar_lea.vmem %s27_s28, 256  ;;  %p687_p4 = scmp.lt.s32.totalorder %s27_s28, %s27_s28 }
   0x9   :  { %p683_p3 = scmp.ne.s32.totalorder %s27_s28, %s682_s14  ;;  %p688_p5 = scmp.lt.s32.totalorder %s682_s14, %s682_s14 }
   0xb   :  { %p689_p6 = por %p688_p5, %p687_p4 }
   0xd   :  { %p690_p7 = pnand %p689_p6, %p683_p3 }
   0xf   :  { %693 = shalt.err (!%p690_p7)
}
  0x10   :  { %s721_s15 = smov 64   ;;  %s722_s16 = smov 4  }
  0x11   :  { %32 = dma.hbm_to_vmem [thread:$0]  %s902_s3, 256, %s27_s28, [#allocation3], %s721_s15, %s721_s15, %s722_s16  }
  0x12   :  { %716 = dma.done.wait [#allocation3], 256  }
  0x13   :  { %717 = vsyncadd [#allocation3], 4294967040  ;;  %vm99_vm0 = vcmask 1043456   ;;  %vm100_vm1 = vcmask 1044480   ;;  %v723_v0 = vmov 65535   ;;  %v618_v2 = vld [vmem:[#allocation2] sm:$0xff]  }
  0x14   :  { %v101_v1 = vsel %vm99_vm0, 4294967295, %v723_v0  ;;  %v619_v4 = vld [vmem:[#allocation2 + $0x8] sm:$0x1f]   ;;  %559 = vmatprep.subr.bf16.mxu0 %v618_v2  ;;  %v56_v5 = vld [vmem:[%s900_s1] sm:$0xff]  ;;  %vm86_vm2 = vcmask 203776   ;;  %v58_v7 = vld [vmem:[%s900_s1 + $0x10] sm:$0xff] }
  0x15   :  { %v102_v3 = vsel %vm100_vm1, %v101_v1, 0  ;;  %v57_v6 = vld [vmem:[%s900_s1 + $0x8] sm:$0xff]  ;;  %560 = vmatpush3.bf16.msra.mxu0 %v618_v2  ;;  %v59_v10 = vld [vmem:[%s900_s1 + $0x18] sm:$0xff]  ;;  %v620_v11 = vld [vmem:[%s901_s2] sm:$0xff]   ;;  %vm182_vm3 = vcmask 261120   ;;  %s724_s30 = smov [#allocation5]  }
  0x16   :  { %v104_v8 = vand.u32 %v619_v4, %v102_v3  ;;  %v63_v9 = vpack.c.bf16 %v57_v6, %v56_v5  ;;  %v60_v12 = vld [vmem:[%s900_s1 + $0x20] sm:$0xff]  ;;  %v61_v13 = vld [vmem:[%s900_s1 + $0x28] sm:$0xff]  ;;  %v64_v14 = vpack.c.bf16 %v59_v10, %v58_v7  ;;  %v62_v17 = vld [vmem:[%s900_s1 + $0x30] sm:$0x3]  ;;  %s494_s9 = sshll.u32 %s724_s30, 4  ;;  %s495_s9 = int_to_ptr.vmem [resolvable:$true] %s494_s9 }
  0x17   :  { %v65_v15 = vpack.c.bf16 %v61_v13, %v60_v12  ;;  %v621_v16 = vld [vmem:[%s901_s2 + $0x8] sm:$0xff]   ;;  %v622_v18 = vld [vmem:[%s904_s5] sm:$0xff]   ;;  %v66_v21 = vpack.c.bf16 %v62_v17, %v62_v17  ;;  %v47_v23 = vld [vmem:[%s899_s0 + $0x10] sm:$0xff]  ;;  %s694_s10 = scalar_lea.vmem %s495_s9, 896  ;;  %p699_p9 = scmp.lt.s32.totalorder %s495_s9, %s495_s9 }
  0x18   :  { %561 = vmatprep.subr.bf16.mxu0 %v104_v8  ;;  %563 = vmatprep.mubr.msk.bf16.mxu0 %vm86_vm2, %v63_v9  ;;  %v45_v19 = vld [vmem:[%s899_s0] sm:$0xff]  ;;  %v46_v20 = vld [vmem:[%s899_s0 + $0x8] sm:$0xff]  ;;  %v48_v24 = vld [vmem:[%s899_s0 + $0x18] sm:$0xff]  ;;  %p695_p8 = scmp.ne.s32.totalorder %s495_s9, %s694_s10  ;;  %p700_p10 = scmp.lt.s32.totalorder %s694_s10, %s694_s10 }
  0x19   :  { %562 = vmatpush3.bf16.msra.mxu0 %v104_v8  ;;  %583 = vmatprep.subr.bf16.mxu1 %v622_v18  ;;  %v52_v22 = vpack.c.bf16 %v46_v20, %v45_v19  ;;  %v49_v25 = vld [vmem:[%s899_s0 + $0x20] sm:$0xff]  ;;  %v50_v26 = vld [vmem:[%s899_s0 + $0x28] sm:$0xff]  ;;  %v53_v27 = vpack.c.bf16 %v48_v24, %v47_v23  ;;  %v51_v29 = vld [vmem:[%s899_s0 + $0x30] sm:$0x3] }
  0x1a   :  { %571 = vmatprep.subr.bf16.mxu0 %v620_v11  ;;  %584 = vmatpush3.bf16.msra.mxu1 %v622_v18  ;;  %v54_v28 = vpack.c.bf16 %v50_v26, %v49_v25  ;;  %v55_v30 = vpack.c.bf16 %v51_v29, %v51_v29  ;;  %v623_v31 = vld [vmem:[%s904_s5 + $0x8] sm:$0xff]   ;;  %v624_v32 = vld [vmem:[%s904_s5 + $0x10] sm:$0xff]   ;;  %v625_v33 = vld [vmem:[%s904_s5 + $0x18] sm:$0xff]   ;;  %p701_p11 = por %p700_p10, %p699_p9 }
  0x1b   :  { %585 = vmatprep.subr.bf16.mxu1 %v623_v31  ;;  %v626_v34 = vld [vmem:[%s904_s5 + $0x20] sm:$0xff]   ;;  %v627_v35 = vld [vmem:[%s904_s5 + $0x28] sm:$0xff]   ;;  %v628_v36 = vld [vmem:[%s904_s5 + $0x30] sm:$0xff]  }
  0x1c   :  { %564 = vmatmul.mubr.msk.bf16.vlgmr.msra.gmra.mrb[0].mxu0 %vm86_vm2, %v64_v14  ;;  %v629_v37 = vld [vmem:[%s904_s5 + $0x38] sm:$0xff]   ;;  %v518_v42 = vld [vmem:[%s903_s4] ss:$0 sm:$0xff]  ;;  %p702_p12 = pnand %p701_p11, %p695_p8 }
  0x1d   :  { %572 = vmatpush3.bf16.msra.mxu0 %v620_v11  ;;  %567 = vmatprep.mubr.msk.bf16.mxu0 %vm86_vm2, %v65_v15  ;;  %v519_v8 = vld [vmem:[%s905_s6] ss:$0 sm:$0xff] }
  0x1e   :  { %573 = vmatprep.subr.bf16.mxu0 %v621_v16  ;;  %586 = vmatpush3.bf16.msra.mxu1 %v623_v31 }
  0x1f   :  { %587 = vmatprep.subr.bf16.mxu1 %v624_v32 }
  0x21   :  { %574 = vmatpush3.bf16.msra.mxu0 %v621_v16 }
  0x22   :  { %588 = vmatpush3.bf16.msra.mxu1 %v624_v32 }
  0x23   :  { %589 = vmatprep.subr.bf16.mxu1 %v625_v33 }
  0x24   :  { %568 = vmatmul.mubr.msk.bf16.gmra.mrb[4].mxu0 %vm86_vm2, %v66_v21 }
  0x25   :  { %575 = vmatprep.mubr.msk.bf16.mxu0 %vm182_vm3, %v52_v22 }
  0x26   :  { %590 = vmatpush3.bf16.msra.mxu1 %v625_v33 }
  0x27   :  { %591 = vmatprep.subr.bf16.mxu1 %v626_v34 }
  0x2a   :  { %592 = vmatpush3.bf16.msra.mxu1 %v626_v34 }
  0x2b   :  { %593 = vmatprep.subr.bf16.mxu1 %v627_v35 }
  0x2c   :  { %576 = vmatmul.mubr.msk.bf16.vlgmr.msra.gmra.mrb[0].mxu0 %vm182_vm3, %v53_v27 }
  0x2d   :  { %579 = vmatprep.mubr.msk.bf16.mxu0 %vm182_vm3, %v54_v28 }
  0x2e   :  { %594 = vmatpush3.bf16.msra.mxu1 %v627_v35 }
  0x2f   :  { %595 = vmatprep.subr.bf16.mxu1 %v628_v36 }
  0x32   :  { %596 = vmatpush3.bf16.msra.mxu1 %v628_v36 }
  0x33   :  { %597 = vmatprep.subr.bf16.mxu1 %v629_v37 }
  0x34   :  { %580 = vmatmul.mubr.msk.bf16.gmra.mrb[8].mxu0 %vm182_vm3, %v55_v30 }
  0x36   :  { %598 = vmatpush3.bf16.msra.mxu1 %v629_v37 }
  0xf7   :  { %v569_v38 = vpop.f32.mrb[4].mxu0 }
  0xf8   :  { %v156_v39 = vpop.f32.mrb[5].mxu0 }
  0xf9   :  { %v570_v40 = vpop.f32.mrb[6].mxu0 }
  0xfa   :  { %v159_v41 = vpop.f32.mrb[7].mxu0  ;;  %v461_v40 = vld [vmem:[%s906_s7] sm:$0xff] }
  0xfb   :  { %vm468_vm5 = vcmp.ne.f32.partialorder %v461_v40, 0.0 }
  0xff   :  { %v577_v43 = vpop.f32.mrb[0].mxu0 }
 0x100   :  { %v268_v44 = vadd.f32 %v577_v43, %v518_v42  ;;  %v229_v45 = vpop.f32.mrb[1].mxu0 }
 0x101   :  { %v266_v46 = vadd.f32 %v518_v42, %v229_v45  ;;  %v578_v47 = vpop.f32.mrb[2].mxu0 }
 0x102   :  { %630 = vtanh.f32 %v268_v44  ;;  %v269_v48 = vadd.f32 %v578_v47, %v518_v42  ;;  %v232_v49 = vpop.f32.mrb[3].mxu0  ;;  %v462_v44 = vld [vmem:[%s906_s7 + $0x8] sm:$0xff] }
 0x103   :  { %632 = vtanh.f32 %v266_v46  ;;  %v267_v50 = vadd.f32 %v518_v42, %v232_v49  ;;  %vm469_vm7 = vcmp.ne.f32.partialorder %v462_v44, 0.0 }
 0x104   :  { %634 = vtanh.f32 %v269_v48 }
 0x105   :  { %636 = vtanh.f32 %v267_v50 }
 0x107   :  { %v581_v51 = vpop.f32.mrb[8].mxu0 }
 0x108   :  { %v254_v52 = vadd.f32 %v581_v51, %v569_v38  ;;  %v245_v53 = vpop.f32.mrb[9].mxu0 }
 0x109   :  { %v246_v54 = vadd.f32 %v245_v53, %v156_v39  ;;  %v582_v55 = vpop.f32.mrb[10].mxu0  ;;  %v463_v39 = vld [vmem:[%s906_s7 + $0x10] sm:$0xff] }
 0x10a   :  { %v272_v56 = vadd.f32 %v518_v42, %v254_v52  ;;  %v248_v57 = vpop.f32.mrb[11].mxu0  ;;  %vm470_vm4 = vcmp.ne.f32.partialorder %v463_v39, 0.0 }
 0x10b   :  { %v270_v58 = vadd.f32 %v518_v42, %v246_v54  ;;  %v249_v59 = vadd.f32 %v248_v57, %v159_v41 }
 0x10c   :  { %v631_v60 = vpop.eup %630  ;;  %638 = vtanh.f32 %v272_v56  ;;  %v467_v56 = vld [vmem:[%s906_s7 + $0x30] sm:$0x3] }
 0x10d   :  { %v633_v61 = vpop.eup %632  ;;  %v271_v62 = vadd.f32 %v518_v42, %v249_v59  ;;  %640 = vtanh.f32 %v270_v58  ;;  %v464_v42 = vld [vmem:[%s906_s7 + $0x18] sm:$0xff]  ;;  %v465_v58 = vld [vmem:[%s906_s7 + $0x20] sm:$0xff]  ;;  %vm474_vm8 = vcmp.ne.f32.partialorder %v467_v56, 0.0 }
 0x10e   :  { %v635_v63 = vpop.eup %634  ;;  %vm471_vm6 = vcmp.ne.f32.partialorder %v464_v42, 0.0  ;;  %vm472_vm9 = vcmp.ne.f32.partialorder %v465_v58, 0.0 }
 0x10f   :  { %v637_v0 = vpop.eup %636  ;;  %642 = vtanh.f32 %v271_v62  ;;  %v281_v1 = vpack.c.bf16 %v635_v63, %v631_v60  ;;  %v466_v63 = vld [vmem:[%s906_s7 + $0x28] sm:$0xff] }
 0x110   :  { %v280_v2 = vpack.c.bf16 %v637_v0, %v633_v61  ;;  %vm473_vm10 = vcmp.ne.f32.partialorder %v466_v63, 0.0 }
 0x112   :  { %599 = vmatprep.mubr.bf16.mxu1 %v280_v2 }
 0x113   :  { %600 = vmatmul.mubr.bf16.vlgmr.msra.gmra.mrb[0].mxu1 %v281_v1 }
 0x116   :  { %v639_v3 = vpop.eup %638 }
 0x117   :  { %v641_v4 = vpop.eup %640  ;;  %v283_v7 = vpack.c.bf16 %v639_v3, %v639_v3 }
 0x119   :  { %v643_v5 = vpop.eup %642 }
 0x11a   :  { %v282_v6 = vpack.c.bf16 %v643_v5, %v641_v4 }
 0x11c   :  { %603 = vmatprep.mubr.bf16.mxu1 %v282_v6 }
 0x11d   :  { %604 = vmatmul.mubr.bf16.gmra.mrb[4].mxu1 %v283_v7 }
 0x1e6   :  { %v601_v9 = vpop.f32.mrb[0].mxu1 }
 0x1e7   :  { %v398_v10 = vadd.f32 %v601_v9, %v519_v8  ;;  %v389_v11 = vpop.f32.mrb[1].mxu1 }
 0x1e8   :  { %v390_v12 = vadd.f32 %v519_v8, %v389_v11  ;;  %v602_v13 = vpop.f32.mrb[2].mxu1 }
 0x1e9   :  { %v530_v14 = vmul.f32 -1.442695, %v398_v10  ;;  %v401_v15 = vadd.f32 %v602_v13, %v519_v8  ;;  %v392_v16 = vpop.f32.mrb[3].mxu1 }
 0x1ea   :  { %v528_v17 = vmul.f32 -1.442695, %v390_v12  ;;  %v393_v18 = vadd.f32 %v519_v8, %v392_v16 }
 0x1eb   :  { %644 = vpow2.f32 %v530_v14  ;;  %v531_v19 = vmul.f32 -1.442695, %v401_v15 }
 0x1ec   :  { %646 = vpow2.f32 %v528_v17  ;;  %v529_v20 = vmul.f32 -1.442695, %v393_v18 }
 0x1ed   :  { %648 = vpow2.f32 %v531_v19 }
 0x1ee   :  { %650 = vpow2.f32 %v529_v20 }
 0x1f0   :  { %v605_v21 = vpop.f32.mrb[4].mxu1 }
 0x1f1   :  { %v414_v22 = vadd.f32 %v605_v21, %v519_v8  ;;  %v405_v23 = vpop.f32.mrb[5].mxu1 }
 0x1f2   :  { %v406_v24 = vadd.f32 %v519_v8, %v405_v23  ;;  %v606_v25 = vpop.f32.mrb[6].mxu1 }
 0x1f3   :  { %v534_v26 = vmul.f32 -1.442695, %v414_v22  ;;  %v408_v27 = vpop.f32.mrb[7].mxu1 }
 0x1f4   :  { %v532_v28 = vmul.f32 -1.442695, %v406_v24  ;;  %v409_v29 = vadd.f32 %v519_v8, %v408_v27 }
 0x1f5   :  { %v645_v30 = vpop.eup %644  ;;  %652 = vpow2.f32 %v534_v26 }
 0x1f6   :  { %v647_v31 = vpop.eup %646  ;;  %v442_v32 = vadd.f32 1.0, %v645_v30  ;;  %654 = vpow2.f32 %v532_v28  ;;  %v533_v37 = vmul.f32 -1.442695, %v409_v29 }
 0x1f7   :  { %v649_v33 = vpop.eup %648  ;;  %v440_v34 = vadd.f32 1.0, %v647_v31 }
 0x1f8   :  { %v651_v35 = vpop.eup %650  ;;  %656 = vrcp.f32 %v442_v32  ;;  %v443_v36 = vadd.f32 1.0, %v649_v33 }
 0x1f9   :  { %658 = vrcp.f32 %v440_v34  ;;  %v441_v38 = vadd.f32 1.0, %v651_v35 }
 0x1fa   :  { %660 = vrcp.f32 %v443_v36 }
 0x1fb   :  { %662 = vrcp.f32 %v441_v38 }
 0x1fc   :  { %664 = vpow2.f32 %v533_v37 }
 0x1ff   :  { %v653_v41 = vpop.eup %652 }
 0x200   :  { %v655_v43 = vpop.eup %654  ;;  %v446_v45 = vadd.f32 1.0, %v653_v41 }
 0x201   :  { %v444_v46 = vadd.f32 1.0, %v655_v43 }
 0x202   :  { %v657_v47 = vpop.eup %656  ;;  %666 = vrcp.f32 %v446_v45 }
 0x203   :  { %v659_v48 = vpop.eup %658  ;;  %v477_v49 = vsel %vm470_vm4, 0.0, %v657_v47  ;;  %668 = vrcp.f32 %v444_v46 }
 0x204   :  { %v661_v50 = vpop.eup %660  ;;  %484 = vst [vmem:[#allocation5 + $0x10] sm:$0xff] %v477_v49  ;;  %v475_v51 = vsel %vm468_vm5, 0.0, %v659_v48 }
 0x205   :  { %v663_v52 = vpop.eup %662  ;;  %482 = vst [vmem:[#allocation5] sm:$0xff] %v475_v51  ;;  %v478_v53 = vsel %vm471_vm6, 0.0, %v661_v50 }
 0x206   :  { %v665_v54 = vpop.eup %664  ;;  %485 = vst [vmem:[#allocation5 + $0x18] sm:$0xff] %v478_v53  ;;  %v476_v55 = vsel %vm469_vm7, 0.0, %v663_v52 }
 0x207   :  { %483 = vst [vmem:[#allocation5 + $0x8] sm:$0xff] %v476_v55  ;;  %v445_v57 = vadd.f32 1.0, %v665_v54 }
 0x209   :  { %670 = vrcp.f32 %v445_v57 }
 0x20c   :  { %v667_v59 = vpop.eup %666 }
 0x20d   :  { %v669_v60 = vpop.eup %668  ;;  %v481_v61 = vsel %vm474_vm8, 0.0, %v667_v59 }
 0x20e   :  { %488 = vst [vmem:[#allocation5 + $0x30] sm:$0x3] %v481_v61  ;;  %v479_v62 = vsel %vm472_vm9, 0.0, %v669_v60 }
 0x20f   :  { %486 = vst [vmem:[#allocation5 + $0x20] sm:$0xff] %v479_v62 }
 0x213   :  { %v671_v0 = vpop.eup %670 }
 0x214   :  { %v480_v1 = vsel %vm473_vm10, 0.0, %v671_v0 }
 0x215   :  { %487 = vst [vmem:[#allocation5 + $0x28] sm:$0xff] %v480_v1 }
 0x216   :  { %705 = shalt.err (!%p702_p12)
}
 0x217   :  { %s706_s12 = scalar_lea.hbm %s907_s8, 896 }
 0x218   :  { %p707_p13 = scmp.ne.s32.totalorder %s907_s8, %s706_s12  ;;  %p710_p0 = scmp.lt.u32.totalorder %s706_s12, %s907_s8 }
 0x21a   :  { %p712_p1 = pnand %p710_p0, %p707_p13 }
 0x21c   :  { %715 = shalt.err (!%p712_p1)
}
 0x21d   :  { %s725_s16 = smov 128   ;;  %s726_s17 = smov 8  }
 0x21e   :  { %500 = dma.vmem_to_hbm [thread:$0]  %s495_s9, 896, %s907_s8, [#allocation4], %s725_s16, %s725_s16, %s726_s17  }
 0x21f   :  { %718 = dma.done.wait [#allocation4], 896  }
 0x220   :  { %719 = vsyncadd [#allocation4], 4294966400 }
 0x221   :  { %504 = vsyncpa [#allocation3], 1 }
 0x222   :  { %505 = vsyncpa [#allocation4], 1 }

</bundles_post_ra>
